<compile_context>
chip_gen: v7x
topology: tpu7x:2x2x1
jax: 0.10.0
libtpu: 0.0.40
codegen_flags: <defaults>
</compile_context>

<pallas_src>
import functools

import jax
import jax.numpy as jnp
from jax.experimental import pallas as pl
from jax.experimental.pallas import tpu as pltpu


def _round_up(n: int, m: int) -> int:
    return ((n + m - 1) // m) * m


def _pad2d(a, rows: int, cols: int):
    r, c = a.shape
    return jnp.pad(a, ((0, rows - r), (0, cols - c)))


def map_net_kernel(x_ref, w1_ref, b1_ref, w2_ref, b2_ref, latent_ref, out_ref):
    # fc1 + ReLU: MXU matmul (f32 accumulate), bias/ReLU epilogue in f32 on VPU.
    h = jnp.dot(x_ref[...], w1_ref[...], preferred_element_type=jnp.float32)
    h = jnp.maximum(h + b1_ref[...], 0.0)
    latent_ref[...] = h.astype(latent_ref.dtype)

    # fc2 (operands in the matmul dtype, f32 accumulate).
    z = jnp.dot(h.astype(w2_ref.dtype), w2_ref[...],
                preferred_element_type=jnp.float32)
    z = z + b2_ref[...]

    # F.normalize(dim=1).  max(sqrt(sq), 1e-12) == sqrt(max(sq, 1e-24)),
    # so an EUP rsqrt + VPU multiply preserves the PyTorch eps semantics while
    # avoiding a per-element divide.  Padded feature columns are zero, so they
    # do not perturb the row norm.
    sq = jnp.sum(z * z, axis=1, keepdims=True)
    inv = jax.lax.rsqrt(jnp.maximum(sq, 1e-24))
    out_ref[...] = (z * inv).astype(out_ref.dtype)


@functools.partial(jax.jit, static_argnames=("block_batch", "compute_dtype"))
def map_net_forward(x, w1, b1, w2, b2, *, block_batch=512,
                    compute_dtype=jnp.float32):
    """x: [B, resSize]; w1: [resSize, embedSize] (pre-transposed, i.e. fc1.weight.T);
    b1: [1, embedSize]; w2: [embedSize, resSize]; b2: [1, resSize].
    Returns (latent [B, embedSize] f32, out_z [B, resSize] f32)."""
    B, res = x.shape
    embed = w1.shape[1]

    # Lane-dense padded feature dims; batch padded to a multiple of the tile.
    res_p = _round_up(res, 128)
    embed_p = _round_up(embed, 128)
    tb = _round_up(max(8, min(block_batch, _round_up(B, 8))), 8)
    b_p = _round_up(B, tb)
    grid = (pl.cdiv(b_p, tb),)

    # Zero-pad: padded weight rows/cols and bias entries are zero, so valid
    # outputs are bit-identical to the unpadded computation.
    xp = _pad2d(x, b_p, res_p).astype(compute_dtype)
    w1p = _pad2d(w1, res_p, embed_p).astype(compute_dtype)
    w2p = _pad2d(w2, embed_p, res_p).astype(compute_dtype)
    b1p = _pad2d(b1.reshape(1, -1), 1, embed_p).astype(jnp.float32)
    b2p = _pad2d(b2.reshape(1, -1), 1, res_p).astype(jnp.float32)

    out_dtype = jnp.float32
    latent_shape = jax.ShapeDtypeStruct((b_p, embed_p), out_dtype)
    out_shape = jax.ShapeDtypeStruct((b_p, res_p), out_dtype)

    # Batch-tiled activations; weights/biases have constant index_maps so they
    # stay VMEM-resident across all grid steps.
    in_specs = [
        pl.BlockSpec((tb, res_p), lambda i: (i, 0)),        # x tile
        pl.BlockSpec((res_p, embed_p), lambda i: (0, 0)),   # w1 (resident)
        pl.BlockSpec((1, embed_p), lambda i: (0, 0)),       # b1 (resident)
        pl.BlockSpec((embed_p, res_p), lambda i: (0, 0)),   # w2 (resident)
        pl.BlockSpec((1, res_p), lambda i: (0, 0)),         # b2 (resident)
    ]
    out_specs = (
        pl.BlockSpec((tb, embed_p), lambda i: (i, 0)),      # latent tile
        pl.BlockSpec((tb, res_p), lambda i: (i, 0)),        # out_z tile
    )

    # VMEM budget: double-buffered activation tiles + (conservatively
    # double-buffered) weights, with headroom; clamped to the 32 MiB scoped
    # default so it is safe against v7x's 64 MiB physical VMEM.
    op_bytes = jnp.dtype(compute_dtype).itemsize
    act_bytes = 2 * tb * (res_p * op_bytes + (embed_p + res_p) * 4)
    wgt_bytes = 2 * (2 * res_p * embed_p * op_bytes + (embed_p + res_p) * 4)
    vmem_limit = int(min(max(2 * (act_bytes + wgt_bytes), 4 * 1024 * 1024),
                         32 * 1024 * 1024))

    cost = pl.CostEstimate(
        flops=4 * b_p * res_p * embed_p,        # two matmuls, 2*M*N*K each
        transcendentals=b_p,                    # one rsqrt per row
        bytes_accessed=(b_p * res_p * op_bytes              # x
                        + 2 * res_p * embed_p * op_bytes    # w1, w2
                        + (embed_p + res_p) * 4             # biases
                        + b_p * (embed_p + res_p) * 4),     # latent, out_z
    )

    latent_p, out_p = pl.pallas_call(
        map_net_kernel,
        out_shape=(latent_shape, out_shape),
        grid=grid,
        in_specs=in_specs,
        out_specs=out_specs,
        compiler_params=pltpu.CompilerParams(
            dimension_semantics=("parallel",),   # megacore sharding on v7x
            vmem_limit_bytes=vmem_limit,
        ),
        cost_estimate=cost,
    )(xp, w1p, b1p, w2p, b2p)

    # Strip batch/feature padding outside the kernel.
    return latent_p[:B, :embed], out_p[:B, :res]


def init_params(key, res_size, embed_size):
    """weights_init: Linear weights ~ N(0, 0.02), biases = 0.
    Weights are stored pre-transposed as [in_features, out_features]."""
    k1, k2 = jax.random.split(key)
    w1 = 0.02 * jax.random.normal(k1, (res_size, embed_size), dtype=jnp.float32)
    b1 = jnp.zeros((1, embed_size), dtype=jnp.float32)
    w2 = 0.02 * jax.random.normal(k2, (embed_size, res_size), dtype=jnp.float32)
    b2 = jnp.zeros((1, res_size), dtype=jnp.float32)
    return w1, b1, w2, b2


if __name__ == "__main__":
    # Small opt-like config; deliberately not multiples of 8/128 so the
    # wrapper-side padding and multi-step batch grid are both exercised.
    B, RES, EMBED = 200, 96, 48

    key = jax.random.PRNGKey(0)
    kx, kp = jax.random.split(key)
    x = jax.random.normal(kx, (B, RES), dtype=jnp.float32)
    w1, b1, w2, b2 = init_params(kp, RES, EMBED)

    # block_batch=128 -> padded batch 256 -> 2 grid steps.
    latent, out_z = map_net_forward(x, w1, b1, w2, b2, block_batch=128)
    jax.block_until_ready((latent, out_z))

    # Pure-JAX reference check (matches torch semantics).
    h_ref = jnp.maximum(x @ w1 + b1, 0.0)
    z_ref = h_ref @ w2 + b2
    n_ref = jnp.maximum(jnp.linalg.norm(z_ref, axis=1, keepdims=True), 1e-12)
    out_ref = z_ref / n_ref

    assert latent.shape == (B, EMBED) and out_z.shape == (B, RES)
    assert jnp.allclose(latent, h_ref, atol=1e-5, rtol=1e-5)
    assert jnp.allclose(out_z, out_ref, atol=1e-5, rtol=1e-5)

    print("KERNEL_OK")
</pallas_src>

<mosaic_0001>
module attributes {stable_mosaic.version = 11 : i64} {
  func.func @map_net_kernel(%arg0: i32, %arg1: memref<128x128xf32, #tpu.memory_space<vmem>>, %arg2: memref<128x128xf32, #tpu.memory_space<vmem>>, %arg3: memref<1x128xf32, #tpu.memory_space<vmem>>, %arg4: memref<128x128xf32, #tpu.memory_space<vmem>>, %arg5: memref<1x128xf32, #tpu.memory_space<vmem>>, %arg6: memref<128x128xf32, #tpu.memory_space<vmem>>, %arg7: memref<128x128xf32, #tpu.memory_space<vmem>>) attributes {dimension_semantics = [#tpu.dimension_semantics<parallel>], iteration_bounds = array<i64: 2>, scalar_prefetch = 0 : i64, scratch_operands = 0 : i64, tpu.core_type = #tpu.core_type<tc>, window_params = [{transform_indices = @transform_0, window_bounds = array<i64: 128, 128>}, {pipeline_mode = #tpu.pipeline_mode<synchronous>, transform_indices = @transform_1, window_bounds = array<i64: 128, 128>}, {pipeline_mode = #tpu.pipeline_mode<synchronous>, transform_indices = @transform_2, window_bounds = array<i64: 1, 128>}, {pipeline_mode = #tpu.pipeline_mode<synchronous>, transform_indices = @transform_3, window_bounds = array<i64: 128, 128>}, {pipeline_mode = #tpu.pipeline_mode<synchronous>, transform_indices = @transform_4, window_bounds = array<i64: 1, 128>}, {transform_indices = @transform_5, window_bounds = array<i64: 128, 128>}, {transform_indices = @transform_6, window_bounds = array<i64: 128, 128>}]} {
    %c0 = arith.constant 0 : index
    %c0_0 = arith.constant 0 : index
    %0 = vector.load %arg1[%c0, %c0_0] : memref<128x128xf32, #tpu.memory_space<vmem>>, vector<128x128xf32>
    %c0_1 = arith.constant 0 : index
    %c0_2 = arith.constant 0 : index
    %1 = vector.load %arg2[%c0_1, %c0_2] : memref<128x128xf32, #tpu.memory_space<vmem>>, vector<128x128xf32>
    %cst = arith.constant dense<0.000000e+00> : vector<128x128xf32>
    %2 = tpu.matmul %0, %1, %cst {dimension_numbers = #tpu.dot_dimension_numbers<[1], [0], [0], [1], [0, 0, 1, 1], [], []>} : vector<128x128xf32>, vector<128x128xf32>, vector<128x128xf32> -> vector<128x128xf32>
    %c0_3 = arith.constant 0 : index
    %c0_4 = arith.constant 0 : index
    %3 = vector.load %arg3[%c0_3, %c0_4] : memref<1x128xf32, #tpu.memory_space<vmem>>, vector<1x128xf32>
    %4 = vector.broadcast %3 : vector<1x128xf32> to vector<128x128xf32>
    %5 = arith.addf %2, %4 : vector<128x128xf32>
    %cst_5 = arith.constant 0.000000e+00 : f32
    %6 = vector.broadcast %cst_5 : f32 to vector<128x128xf32>
    %7 = arith.maximumf %5, %6 : vector<128x128xf32>
    %c0_6 = arith.constant 0 : index
    %c0_7 = arith.constant 0 : index
    %8 = vector.load %arg6[%c0_6, %c0_7] : memref<128x128xf32, #tpu.memory_space<vmem>>, vector<128x128xf32>
    tpu.vector_store %arg6[%c0_6, %c0_7], %7 {strides = array<i32>} : memref<128x128xf32, #tpu.memory_space<vmem>>, vector<128x128xf32>,
    %c0_8 = arith.constant 0 : index
    %c0_9 = arith.constant 0 : index
    %9 = vector.load %arg4[%c0_8, %c0_9] : memref<128x128xf32, #tpu.memory_space<vmem>>, vector<128x128xf32>
    %cst_10 = arith.constant dense<0.000000e+00> : vector<128x128xf32>
    %10 = tpu.matmul %7, %9, %cst_10 {dimension_numbers = #tpu.dot_dimension_numbers<[1], [0], [0], [1], [0, 0, 1, 1], [], []>} : vector<128x128xf32>, vector<128x128xf32>, vector<128x128xf32> -> vector<128x128xf32>
    %c0_11 = arith.constant 0 : index
    %c0_12 = arith.constant 0 : index
    %11 = vector.load %arg5[%c0_11, %c0_12] : memref<1x128xf32, #tpu.memory_space<vmem>>, vector<1x128xf32>
    %12 = vector.broadcast %11 : vector<1x128xf32> to vector<128x128xf32>
    %13 = arith.addf %10, %12 : vector<128x128xf32>
    %14 = arith.mulf %13, %13 : vector<128x128xf32>
    %cst_13 = arith.constant dense<0.000000e+00> : vector<128xf32>
    %15 = vector.multi_reduction <add>, %14, %cst_13 [1] : vector<128x128xf32> to vector<128xf32>
    %16 = vector.shape_cast %15 : vector<128xf32> to vector<128x1xf32>
    %cst_14 = arith.constant 1.000000e-24 : f32
    %17 = vector.broadcast %cst_14 : f32 to vector<128x1xf32>
    %18 = arith.maximumf %16, %17 : vector<128x1xf32>
    %19 = math.rsqrt %18 : vector<128x1xf32>
    %20 = vector.broadcast %19 : vector<128x1xf32> to vector<128x128xf32>
    %21 = arith.mulf %13, %20 : vector<128x128xf32>
    %c0_15 = arith.constant 0 : index
    %c0_16 = arith.constant 0 : index
    %22 = vector.load %arg7[%c0_15, %c0_16] : memref<128x128xf32, #tpu.memory_space<vmem>>, vector<128x128xf32>
    tpu.vector_store %arg7[%c0_15, %c0_16], %21 {strides = array<i32>} : memref<128x128xf32, #tpu.memory_space<vmem>>, vector<128x128xf32>,
    return
  }
  func.func @transform_0(%arg0: i32) -> (i32, i32) {
    %c0_i32 = arith.constant 0 : i32
    %c0_i32_0 = arith.constant 0 : i32
    return %arg0, %c0_i32 : i32, i32
  }
  func.func @transform_1(%arg0: i32) -> (i32, i32) {
    %c0_i32 = arith.constant 0 : i32
    %c0_i32_0 = arith.constant 0 : i32
    %c0_i32_1 = arith.constant 0 : i32
    return %c0_i32, %c0_i32_0 : i32, i32
  }
  func.func @transform_2(%arg0: i32) -> (i32, i32) {
    %c0_i32 = arith.constant 0 : i32
    %c0_i32_0 = arith.constant 0 : i32
    %c0_i32_1 = arith.constant 0 : i32
    return %c0_i32, %c0_i32_0 : i32, i32
  }
  func.func @transform_3(%arg0: i32) -> (i32, i32) {
    %c0_i32 = arith.constant 0 : i32
    %c0_i32_0 = arith.constant 0 : i32
    %c0_i32_1 = arith.constant 0 : i32
    return %c0_i32, %c0_i32_0 : i32, i32
  }
  func.func @transform_4(%arg0: i32) -> (i32, i32) {
    %c0_i32 = arith.constant 0 : i32
    %c0_i32_0 = arith.constant 0 : i32
    %c0_i32_1 = arith.constant 0 : i32
    return %c0_i32, %c0_i32_0 : i32, i32
  }
  func.func @transform_5(%arg0: i32) -> (i32, i32) {
    %c0_i32 = arith.constant 0 : i32
    %c0_i32_0 = arith.constant 0 : i32
    return %arg0, %c0_i32 : i32, i32
  }
  func.func @transform_6(%arg0: i32) -> (i32, i32) {
    %c0_i32 = arith.constant 0 : i32
    %c0_i32_0 = arith.constant 0 : i32
    return %arg0, %c0_i32 : i32, i32
  }
}

</mosaic_0001>

<bundles_post_ra>
// kernel: map_net_forward.1
= control target key start
LH: loop header
LB: loop body
LE: loop exit
PB: predicated region body
PF: predicated region fallthrough
CT: control target
= control target key end

     0   :  { %s1193_s21 = smov 0   ;;  %s1472_s0 = inlined_call_operand.vmem [shape: f32[256,128], index: 0, kind: input, shape index: {}]   ;;  %s1473_s1 = inlined_call_operand.vmem [shape: f32[128,128], index: 1, kind: input, shape index: {}]   ;;  %s1474_s2 = inlined_call_operand.vmem [shape: f32[1,128], index: 2, kind: input, shape index: {}]   ;;  %s1475_s3 = inlined_call_operand.vmem [shape: f32[128,128], index: 3, kind: input, shape index: {}]   ;;  %s1476_s4 = inlined_call_operand.vmem [shape: f32[1,128], index: 4, kind: input, shape index: {}]   ;;  %s1477_s5 = inlined_call_operand.vmem [shape: f32[256,128], index: 5, kind: output, shape index: {0}]   ;;  %s1478_s6 = inlined_call_operand.vmem [shape: f32[256,128], index: 6, kind: output, shape index: {1}]  }
   0x1 LB: > { %s855_s22 = sadd.s32 4294967295, %s1156_s21   ;;  %p859_p0 = scmp.ge.s32.totalorder %s1156_s21, 1  ;;  %s1156_s21 = sphi %s1193_s21, %s17_s21  }
   0x2   : > { %p216_p1 = scmp.lt.s32.totalorder %s1156_s21, 3 }
   0x4   : > { %p217_p2 = pnand %p859_p0, %p216_p1 }
   0x5   : > { %v285_v0 = vld [vmem:[%s1473_s1] sm:$0xff] (!%p217_p2)  ;;  %v286_v1 = vld [vmem:[%s1473_s1 + $0x8] sm:$0xff] (!%p217_p2)  ;;  %v287_v2 = vld [vmem:[%s1473_s1 + $0x10] sm:$0xff] (!%p217_p2)  ;;  %s860_s29 = sshll.u32 (!%p217_p2), %s855_s22, 4 }
   0x6   : > { %220 = sbr.rel (%p217_p2) target bundleno = 664 (0x298), region = 40  ;;  %v1046_v3 = vpack.c.bf16 (!%p217_p2), %v286_v1, %v285_v0  ;;  %v288_v4 = vld [vmem:[%s1473_s1 + $0x18] sm:$0xff] (!%p217_p2)  ;;  %p252_p3 = scmp.lt.s32.totalorder (!%p217_p2), %s860_s29, 31  ;;  %v289_v6 = vld [vmem:[%s1473_s1 + $0x20] sm:$0xff] (!%p217_p2)  ;;  %v290_v7 = vld [vmem:[%s1473_s1 + $0x28] sm:$0xff] (!%p217_p2) }
   0x7   : > { %v1050_v5 = vpack.c.bf16 (!%p217_p2), %v288_v4, %v287_v2  ;;  %v1054_v8 = vpack.c.bf16 (!%p217_p2), %v290_v7, %v289_v6  ;;  %v291_v9 = vld [vmem:[%s1473_s1 + $0x30] sm:$0xff] (!%p217_p2)  ;;  %v485_v10 = vld [vmem:[%s1475_s3] sm:$0xff] (!%p217_p2)  ;;  %v486_v11 = vld [vmem:[%s1475_s3 + $0x8] sm:$0xff] (!%p217_p2) }
   0x8   : > { %1047 = vmatprep.subr.bf16.mxu0 (!%p217_p2), %v1046_v3  ;;  %v292_v12 = vld [vmem:[%s1473_s1 + $0x38] sm:$0xff] (!%p217_p2)  ;;  %v1078_v13 = vpack.c.bf16 (!%p217_p2), %v486_v11, %v485_v10  ;;  %v487_v14 = vld [vmem:[%s1475_s3 + $0x10] sm:$0xff] (!%p217_p2)  ;;  %v293_v19 = vld [vmem:[%s1473_s1 + $0x40] sm:$0xff] (!%p217_p2) }
   0x9   : > { %1049 = vmatpush3.bf16.msra.mxu0 (!%p217_p2), %v1046_v3  ;;  %v488_v15 = vld [vmem:[%s1475_s3 + $0x18] sm:$0xff] (!%p217_p2)  ;;  %v1058_v18 = vpack.c.bf16 (!%p217_p2), %v292_v12, %v291_v9  ;;  %v294_v20 = vld [vmem:[%s1473_s1 + $0x48] sm:$0xff] (!%p217_p2)  ;;  %v489_v21 = vld [vmem:[%s1475_s3 + $0x20] sm:$0xff] (!%p217_p2) }
   0xa   : > { %1051 = vmatprep.subr.bf16.mxu0 (!%p217_p2), %v1050_v5  ;;  %v1082_v17 = vpack.c.bf16 (!%p217_p2), %v488_v15, %v487_v14  ;;  %1079 = vmatprep.subr.bf16.mxu1 (!%p217_p2), %v1078_v13  ;;  %v490_v22 = vld [vmem:[%s1475_s3 + $0x28] sm:$0xff] (!%p217_p2)  ;;  %v491_v23 = vld [vmem:[%s1475_s3 + $0x30] sm:$0xff] (!%p217_p2)  ;;  %v1062_v24 = vpack.c.bf16 (!%p217_p2), %v294_v20, %v293_v19  ;;  %v492_v26 = vld [vmem:[%s1475_s3 + $0x38] sm:$0xff] (!%p217_p2) }
   0xb   : > { %1081 = vmatpush3.bf16.msra.mxu1 (!%p217_p2), %v1078_v13  ;;  %v1086_v25 = vpack.c.bf16 (!%p217_p2), %v490_v22, %v489_v21  ;;  %v295_v27 = vld [vmem:[%s1473_s1 + $0x50] sm:$0xff] (!%p217_p2)  ;;  %v296_v28 = vld [vmem:[%s1473_s1 + $0x58] sm:$0xff] (!%p217_p2)  ;;  %v1090_v29 = vpack.c.bf16 (!%p217_p2), %v492_v26, %v491_v23  ;;  %v493_v30 = vld [vmem:[%s1475_s3 + $0x40] sm:$0xff] (!%p217_p2) }
   0xc   : > { %1083 = vmatprep.subr.bf16.mxu1 (!%p217_p2), %v1082_v17  ;;  %v494_v31 = vld [vmem:[%s1475_s3 + $0x48] sm:$0xff] (!%p217_p2)  ;;  %v1066_v32 = vpack.c.bf16 (!%p217_p2), %v296_v28, %v295_v27  ;;  %v297_v33 = vld [vmem:[%s1473_s1 + $0x60] sm:$0xff] (!%p217_p2)  ;;  %v495_v36 = vld [vmem:[%s1475_s3 + $0x50] sm:$0xff] (!%p217_p2) }
   0xd   : > { %s1480_s29 = smov (!%p252_p3, %s860_s29), 31  ;;  %1053 = vmatpush3.bf16.msra.mxu0 %v1050_v5  ;;  %v298_v34 = vld [vmem:[%s1473_s1 + $0x68] sm:$0xff]  ;;  %v1094_v35 = vpack.c.bf16 %v494_v31, %v493_v30  ;;  %v496_v37 = vld [vmem:[%s1475_s3 + $0x58] sm:$0xff]  ;;  %v299_v39 = vld [vmem:[%s1473_s1 + $0x70] sm:$0xff] }
   0xe   : > { %s1222_s14 = sshll.u32 %s1480_s29, 3  ;;  %1055 = vmatprep.subr.bf16.mxu0 %v1054_v8  ;;  %v1070_v38 = vpack.c.bf16 %v298_v34, %v297_v33  ;;  %v300_v40 = vld [vmem:[%s1473_s1 + $0x78] sm:$0xff]  ;;  %v1098_v41 = vpack.c.bf16 %v496_v37, %v495_v36  ;;  %v497_v42 = vld [vmem:[%s1475_s3 + $0x60] sm:$0xff]  ;;  %v498_v43 = vld [vmem:[%s1475_s3 + $0x68] sm:$0xff] }
   0xf   : > { %s1237_s24 = scalar_lea.vmem %s1472_s0, %s1222_s14  ;;  %1085 = vmatpush3.bf16.msra.mxu1 %v1082_v17  ;;  %v1074_v44 = vpack.c.bf16 %v300_v40, %v299_v39  ;;  %v1102_v45 = vpack.c.bf16 %v498_v43, %v497_v42  ;;  %v499_v61 = vld [vmem:[%s1475_s3 + $0x70] sm:$0xff]  ;;  %v500_v62 = vld [vmem:[%s1475_s3 + $0x78] sm:$0xff]  ;;  %v1324_v0 = vld [vmem:[%s1474_s2] ss:$0 sm:$0xff]  ;;  %s1331_s30 = scalar_lea.vmem %s1477_s5, %s1222_s14 }
  0x10   : > { %v269_v16 = vld [vmem:[%s1237_s24] sm:$0xff]  ;;  %1087 = vmatprep.subr.bf16.mxu1 %v1086_v25  ;;  %v270_v46 = vld [vmem:[%s1237_s24 + $0x8] sm:$0xff]  ;;  %v271_v47 = vld [vmem:[%s1237_s24 + $0x10] sm:$0xff]  ;;  %v1106_v63 = vpack.c.bf16 %v500_v62, %v499_v61  ;;  %s1435_s11 = scalar_lea.vmem %s1478_s6, %s1222_s14 }
  0x11   : > { %966 = vmatprep.mubr.f32.mxu0 %v269_v16  ;;  %1057 = vmatpush3.bf16.msra.mxu0 %v1054_v8  ;;  %v272_v48 = vld [vmem:[%s1237_s24 + $0x18] sm:$0xff]  ;;  %v273_v49 = vld [vmem:[%s1237_s24 + $0x20] sm:$0xff]  ;;  %v274_v50 = vld [vmem:[%s1237_s24 + $0x28] sm:$0xff] }
  0x12   : > { %1059 = vmatprep.subr.bf16.mxu0 %v1058_v18  ;;  %v275_v51 = vld [vmem:[%s1237_s24 + $0x30] sm:$0xff]  ;;  %v276_v52 = vld [vmem:[%s1237_s24 + $0x38] sm:$0xff]  ;;  %v277_v53 = vld [vmem:[%s1237_s24 + $0x40] sm:$0xff] }
  0x13   : > { %1089 = vmatpush3.bf16.msra.mxu1 %v1086_v25  ;;  %v278_v54 = vld [vmem:[%s1237_s24 + $0x48] sm:$0xff]  ;;  %v279_v55 = vld [vmem:[%s1237_s24 + $0x50] sm:$0xff]  ;;  %v280_v56 = vld [vmem:[%s1237_s24 + $0x58] sm:$0xff] }
  0x14   : > { %1091 = vmatprep.subr.bf16.mxu1 %v1090_v29  ;;  %v281_v57 = vld [vmem:[%s1237_s24 + $0x60] sm:$0xff]  ;;  %v282_v58 = vld [vmem:[%s1237_s24 + $0x68] sm:$0xff]  ;;  %v283_v59 = vld [vmem:[%s1237_s24 + $0x70] sm:$0xff] }
  0x15   : > { %1061 = vmatpush3.bf16.msra.mxu0 %v1058_v18  ;;  %v284_v60 = vld [vmem:[%s1237_s24 + $0x78] sm:$0xff] }
  0x16   : > { %1063 = vmatprep.subr.bf16.mxu0 %v1062_v24 }
  0x17   : > { %1093 = vmatpush3.bf16.msra.mxu1 %v1090_v29 }
  0x18   : > { %1095 = vmatprep.subr.bf16.mxu1 %v1094_v35 }
  0x19   : > { %1065 = vmatpush3.bf16.msra.mxu0 %v1062_v24 }
  0x1a   : > { %1067 = vmatprep.subr.bf16.mxu0 %v1066_v32 }
  0x1b   : > { %1097 = vmatpush3.bf16.msra.mxu1 %v1094_v35 }
  0x1c   : > { %1099 = vmatprep.subr.bf16.mxu1 %v1098_v41 }
  0x1d   : > { %1069 = vmatpush3.bf16.msra.mxu0 %v1066_v32 }
  0x1e   : > { %1071 = vmatprep.subr.bf16.mxu0 %v1070_v38 }
  0x1f   : > { %1101 = vmatpush3.bf16.msra.mxu1 %v1098_v41 }
  0x20   : > { %1103 = vmatprep.subr.bf16.mxu1 %v1102_v45 }
  0x21   : > { %1073 = vmatpush3.bf16.msra.mxu0 %v1070_v38 }
  0x22   : > { %1075 = vmatprep.subr.bf16.mxu0 %v1074_v44 }
  0x23   : > { %1105 = vmatpush3.bf16.msra.mxu1 %v1102_v45 }
  0x24   : > { %1107 = vmatprep.subr.bf16.mxu1 %v1106_v63 }
  0x25   : > { %1077 = vmatpush3.bf16.msra.mxu0 %v1074_v44 }
  0x27   : > { %1109 = vmatpush3.bf16.msra.mxu1 %v1106_v63 }
  0x28   : > { %967 = vmatmul.mubr.f32.vlgmr.msra.gmra.mrb[0].mxu0 %v270_v46 }
  0x29   : > { %969 = vmatprep.mubr.f32.mxu0 %v271_v47 }
  0x2c   : > { %970 = vmatmul.mubr.f32.gmra.mrb[2].mxu0 %v272_v48 }
  0x2d   : > { %972 = vmatprep.mubr.f32.mxu0 %v273_v49  ;;  %v867_v49 = vld [vmem:[%s1476_s4] ss:$0 sm:$0xff] }
  0x30   : > { %973 = vmatmul.mubr.f32.gmra.mrb[4].mxu0 %v274_v50 }
  0x31   : > { %975 = vmatprep.mubr.f32.mxu0 %v275_v51 }
  0x34   : > { %976 = vmatmul.mubr.f32.gmra.mrb[6].mxu0 %v276_v52 }
  0x35   : > { %978 = vmatprep.mubr.f32.mxu0 %v277_v53 }
  0x38   : > { %979 = vmatmul.mubr.f32.gmra.mrb[8].mxu0 %v278_v54 }
  0x39   : > { %981 = vmatprep.mubr.f32.mxu0 %v279_v55 }
  0x3c   : > { %982 = vmatmul.mubr.f32.gmra.mrb[10].mxu0 %v280_v56 }
  0x3d   : > { %984 = vmatprep.mubr.f32.mxu0 %v281_v57 }
  0x40   : > { %985 = vmatmul.mubr.f32.gmra.mrb[12].mxu0 %v282_v58 }
  0x41   : > { %987 = vmatprep.mubr.f32.mxu0 %v283_v59 }
  0x44   : > { %988 = vmatmul.mubr.f32.gmra.mrb[14].mxu0 %v284_v60 }
  0xfb   : > { %v968_v1 = vpop.f32.mrb[0].mxu0 }
  0xfc   : > { %v380_v2 = vadd.f32 %v968_v1, %v1324_v0  ;;  %v374_v3 = vpop.f32.mrb[1].mxu0 }
  0xfd   : > { %v375_v4 = vadd.f32 %v1324_v0, %v374_v3 }
  0xfe   : > { %v454_v5 = vmax.f32 %v380_v2, 0.0 }
  0xff   : > { %v453_v6 = vmax.f32 %v375_v4, 0.0  ;;  %v971_v7 = vpop.f32.mrb[2].mxu0 }
 0x100   : > { %470 = vst [vmem:[%s1331_s30 + $0x8] sm:$0xff] %v454_v5  ;;  %v390_v8 = vadd.f32 %v971_v7, %v1324_v0  ;;  %v384_v9 = vpop.f32.mrb[3].mxu0 }
 0x101   : > { %469 = vst [vmem:[%s1331_s30] sm:$0xff] %v453_v6  ;;  %v385_v10 = vadd.f32 %v1324_v0, %v384_v9  ;;  %1022 = vmatprep.mubr.f32.mxu1 %v453_v6 }
 0x102   : > { %v456_v11 = vmax.f32 %v390_v8, 0.0  ;;  %1023 = vmatmul.mubr.f32.vlgmr.msra.gmra.mrb[0].mxu1 %v454_v5 }
 0x103   : > { %v455_v12 = vmax.f32 %v385_v10, 0.0  ;;  %v974_v13 = vpop.f32.mrb[4].mxu0 }
 0x104   : > { %472 = vst [vmem:[%s1331_s30 + $0x18] sm:$0xff] %v456_v11  ;;  %v400_v14 = vadd.f32 %v974_v13, %v1324_v0  ;;  %v394_v15 = vpop.f32.mrb[5].mxu0 }
 0x105   : > { %471 = vst [vmem:[%s1331_s30 + $0x10] sm:$0xff] %v455_v12  ;;  %v395_v16 = vadd.f32 %v1324_v0, %v394_v15  ;;  %1025 = vmatprep.mubr.f32.mxu1 %v455_v12 }
 0x106   : > { %v458_v17 = vmax.f32 %v400_v14, 0.0  ;;  %1026 = vmatmul.mubr.f32.gmra.mrb[2].mxu1 %v456_v11 }
 0x107   : > { %v457_v18 = vmax.f32 %v395_v16, 0.0  ;;  %v977_v19 = vpop.f32.mrb[6].mxu0 }
 0x108   : > { %474 = vst [vmem:[%s1331_s30 + $0x28] sm:$0xff] %v458_v17  ;;  %v410_v20 = vadd.f32 %v977_v19, %v1324_v0  ;;  %v404_v21 = vpop.f32.mrb[7].mxu0 }
 0x109   : > { %473 = vst [vmem:[%s1331_s30 + $0x20] sm:$0xff] %v457_v18  ;;  %v405_v22 = vadd.f32 %v1324_v0, %v404_v21  ;;  %1028 = vmatprep.mubr.f32.mxu1 %v457_v18 }
 0x10a   : > { %v460_v23 = vmax.f32 %v410_v20, 0.0  ;;  %1029 = vmatmul.mubr.f32.gmra.mrb[4].mxu1 %v458_v17 }
 0x10b   : > { %v459_v24 = vmax.f32 %v405_v22, 0.0  ;;  %v980_v25 = vpop.f32.mrb[8].mxu0 }
 0x10c   : > { %476 = vst [vmem:[%s1331_s30 + $0x38] sm:$0xff] %v460_v23  ;;  %v420_v26 = vadd.f32 %v980_v25, %v1324_v0  ;;  %v414_v27 = vpop.f32.mrb[9].mxu0 }
 0x10d   : > { %475 = vst [vmem:[%s1331_s30 + $0x30] sm:$0xff] %v459_v24  ;;  %v415_v28 = vadd.f32 %v1324_v0, %v414_v27  ;;  %1031 = vmatprep.mubr.f32.mxu1 %v459_v24 }
 0x10e   : > { %v462_v29 = vmax.f32 %v420_v26, 0.0  ;;  %1032 = vmatmul.mubr.f32.gmra.mrb[6].mxu1 %v460_v23 }
 0x10f   : > { %v461_v30 = vmax.f32 %v415_v28, 0.0  ;;  %v983_v31 = vpop.f32.mrb[10].mxu0 }
 0x110   : > { %478 = vst [vmem:[%s1331_s30 + $0x48] sm:$0xff] %v462_v29  ;;  %v430_v32 = vadd.f32 %v983_v31, %v1324_v0  ;;  %v424_v33 = vpop.f32.mrb[11].mxu0 }
 0x111   : > { %477 = vst [vmem:[%s1331_s30 + $0x40] sm:$0xff] %v461_v30  ;;  %v425_v34 = vadd.f32 %v1324_v0, %v424_v33  ;;  %1034 = vmatprep.mubr.f32.mxu1 %v461_v30 }
 0x112   : > { %v464_v35 = vmax.f32 %v430_v32, 0.0  ;;  %1035 = vmatmul.mubr.f32.gmra.mrb[8].mxu1 %v462_v29 }
 0x113   : > { %v463_v36 = vmax.f32 %v425_v34, 0.0  ;;  %v986_v37 = vpop.f32.mrb[12].mxu0 }
 0x114   : > { %480 = vst [vmem:[%s1331_s30 + $0x58] sm:$0xff] %v464_v35  ;;  %v440_v38 = vadd.f32 %v986_v37, %v1324_v0  ;;  %v434_v39 = vpop.f32.mrb[13].mxu0 }
 0x115   : > { %479 = vst [vmem:[%s1331_s30 + $0x50] sm:$0xff] %v463_v36  ;;  %v435_v40 = vadd.f32 %v1324_v0, %v434_v39  ;;  %1037 = vmatprep.mubr.f32.mxu1 %v463_v36 }
 0x116   : > { %v466_v41 = vmax.f32 %v440_v38, 0.0  ;;  %1038 = vmatmul.mubr.f32.gmra.mrb[10].mxu1 %v464_v35 }
 0x117   : > { %v465_v42 = vmax.f32 %v435_v40, 0.0  ;;  %v989_v43 = vpop.f32.mrb[14].mxu0 }
 0x118   : > { %482 = vst [vmem:[%s1331_s30 + $0x68] sm:$0xff] %v466_v41  ;;  %v450_v44 = vadd.f32 %v989_v43, %v1324_v0  ;;  %v444_v45 = vpop.f32.mrb[15].mxu0 }
 0x119   : > { %481 = vst [vmem:[%s1331_s30 + $0x60] sm:$0xff] %v465_v42  ;;  %v445_v46 = vadd.f32 %v1324_v0, %v444_v45  ;;  %1040 = vmatprep.mubr.f32.mxu1 %v465_v42 }
 0x11a   : > { %v468_v47 = vmax.f32 %v450_v44, 0.0  ;;  %1041 = vmatmul.mubr.f32.gmra.mrb[12].mxu1 %v466_v41 }
 0x11b   : > { %v467_v48 = vmax.f32 %v445_v46, 0.0 }
 0x11c   : > { %484 = vst [vmem:[%s1331_s30 + $0x78] sm:$0xff] %v468_v47 }
 0x11d   : > { %483 = vst [vmem:[%s1331_s30 + $0x70] sm:$0xff] %v467_v48  ;;  %1043 = vmatprep.mubr.f32.mxu1 %v467_v48 }
 0x11e   : > { %1044 = vmatmul.mubr.f32.gmra.mrb[14].mxu1 %v468_v47 }
 0x1d5   : > { %v1024_v50 = vpop.f32.mrb[0].mxu1 }
 0x1d6   : > { %v1367_v51 = vadd.f32 %v1024_v50, %v867_v49  ;;  %v574_v52 = vpop.f32.mrb[1].mxu1 }
 0x1d7   : > { %v1369_v53 = vadd.f32 %v867_v49, %v574_v52 }
 0x1d8   : > { %v654_v54 = vmul.f32 %v1367_v51, %v1367_v51 }
 0x1d9   : > { %v1027_v55 = vpop.f32.mrb[2].mxu1  ;;  %v653_v60 = vmul.f32 %v1369_v53, %v1369_v53 }
 0x1da   : > { %v1373_v56 = vadd.f32 %v1027_v55, %v867_v49  ;;  %671 = vadd.xlane.f32.xlu0 %v654_v54  ;;  %v584_v57 = vpop.f32.mrb[3].mxu1 }
 0x1db   : > { %v1375_v58 = vadd.f32 %v867_v49, %v584_v57 }
 0x1dc   : > { %v656_v59 = vmul.f32 %v1373_v56, %v1373_v56 }
 0x1dd   : > { %v1030_v61 = vpop.f32.mrb[4].mxu1  ;;  %v655_v1 = vmul.f32 %v1375_v58, %v1375_v58 }
 0x1de   : > { %675 = vadd.xlane.f32.xlu1 %v656_v59  ;;  %v594_v62 = vpop.f32.mrb[5].mxu1  ;;  %669 = vadd.xlane.f32.xlu0 %v653_v60  ;;  %v1383_v0 = vadd.f32 %v1030_v61, %v867_v49 }
 0x1df   : > { %v1381_v63 = vadd.f32 %v867_v49, %v594_v62 }
 0x1e0   : > { %v658_v7 = vmul.f32 %v1383_v0, %v1383_v0 }
 0x1e1   : > { %v1033_v2 = vpop.f32.mrb[6].mxu1  ;;  %v657_v3 = vmul.f32 %v1381_v63, %v1381_v63 }
 0x1e2   : > { %v604_v4 = vpop.f32.mrb[7].mxu1  ;;  %673 = vadd.xlane.f32.xlu1 %v655_v1  ;;  %v1391_v6 = vadd.f32 %v1033_v2, %v867_v49 }
 0x1e3   : > { %v1389_v5 = vadd.f32 %v867_v49, %v604_v4  ;;  %677 = vadd.xlane.f32.xlu0 %v657_v3 }
 0x1e4   : > { %v660_v13 = vmul.f32 %v1391_v6, %v1391_v6 }
 0x1e5   : > { %v1036_v8 = vpop.f32.mrb[8].mxu1  ;;  %v659_v9 = vmul.f32 %v1389_v5, %v1389_v5 }
 0x1e6   : > { %v614_v10 = vpop.f32.mrb[9].mxu1  ;;  %679 = vadd.xlane.f32.xlu1 %v658_v7  ;;  %v1399_v12 = vadd.f32 %v1036_v8, %v867_v49 }
 0x1e7   : > { %v1397_v11 = vadd.f32 %v867_v49, %v614_v10  ;;  %681 = vadd.xlane.f32.xlu0 %v659_v9 }
 0x1e8   : > { %v662_v19 = vmul.f32 %v1399_v12, %v1399_v12 }
 0x1e9   : > { %v1039_v14 = vpop.f32.mrb[10].mxu1  ;;  %v661_v15 = vmul.f32 %v1397_v11, %v1397_v11 }
 0x1ea   : > { %v624_v16 = vpop.f32.mrb[11].mxu1  ;;  %683 = vadd.xlane.f32.xlu1 %v660_v13  ;;  %v1407_v18 = vadd.f32 %v1039_v14, %v867_v49 }
 0x1eb   : > { %v1405_v17 = vadd.f32 %v867_v49, %v624_v16  ;;  %685 = vadd.xlane.f32.xlu0 %v661_v15 }
 0x1ec   : > { %v664_v25 = vmul.f32 %v1407_v18, %v1407_v18 }
 0x1ed   : > { %v1042_v20 = vpop.f32.mrb[12].mxu1  ;;  %v663_v21 = vmul.f32 %v1405_v17, %v1405_v17 }
 0x1ee   : > { %v634_v22 = vpop.f32.mrb[13].mxu1  ;;  %687 = vadd.xlane.f32.xlu1 %v662_v19  ;;  %v1415_v24 = vadd.f32 %v1042_v20, %v867_v49 }
 0x1ef   : > { %v1413_v23 = vadd.f32 %v867_v49, %v634_v22  ;;  %689 = vadd.xlane.f32.xlu0 %v663_v21 }
 0x1f0   : > { %v666_v31 = vmul.f32 %v1415_v24, %v1415_v24 }
 0x1f1   : > { %v1045_v26 = vpop.f32.mrb[14].mxu1  ;;  %v665_v27 = vmul.f32 %v1413_v23, %v1413_v23 }
 0x1f2   : > { %v644_v28 = vpop.f32.mrb[15].mxu1  ;;  %691 = vadd.xlane.f32.xlu1 %v664_v25  ;;  %v1423_v30 = vadd.f32 %v1045_v26, %v867_v49 }
 0x1f3   : > { %v1421_v29 = vadd.f32 %v867_v49, %v644_v28  ;;  %693 = vadd.xlane.f32.xlu0 %v665_v27 }
 0x1f4   : > { %v668_v33 = vmul.f32 %v1423_v30, %v1423_v30 }
 0x1f5   : > { %v667_v32 = vmul.f32 %v1421_v29, %v1421_v29 }
 0x1f6   : > { %695 = vadd.xlane.f32.xlu1 %v666_v31 }
 0x1f7   : > { %697 = vadd.xlane.f32.xlu0 %v667_v32 }
 0x1fa   : > { %699 = vadd.xlane.f32.xlu1 %v668_v33 }
 0x267   : > { %v672_v34 = vpop.xlane.xlu0 %671 }
 0x268   : > { %v702_v35 = vmax.f32 %v672_v34, 1e-24 }
 0x26a   : > { %1118 = vrsqrt.f32 %v702_v35 }
 0x26b   : > { %v676_v36 = vpop.xlane.xlu1 %675  ;;  %v670_v37 = vpop.xlane.xlu0 %669 }
 0x26c   : > { %v704_v38 = vmax.f32 %v676_v36, 1e-24  ;;  %v701_v39 = vmax.f32 %v670_v37, 1e-24 }
 0x26e   : > { %1120 = vrsqrt.f32 %v704_v38 }
 0x26f   : > { %1122 = vrsqrt.f32 %v701_v39  ;;  %v674_v40 = vpop.xlane.xlu1 %673 }
 0x270   : > { %v703_v41 = vmax.f32 %v674_v40, 1e-24  ;;  %v678_v42 = vpop.xlane.xlu0 %677 }
 0x271   : > { %v705_v43 = vmax.f32 %v678_v42, 1e-24 }
 0x272   : > { %1124 = vrsqrt.f32 %v703_v41 }
 0x273   : > { %1126 = vrsqrt.f32 %v705_v43  ;;  %v680_v44 = vpop.xlane.xlu1 %679 }
 0x274   : > { %v1119_v45 = vpop.eup %1118  ;;  %v706_v46 = vmax.f32 %v680_v44, 1e-24  ;;  %v682_v47 = vpop.xlane.xlu0 %681 }
 0x275   : > { %v734_v48 = vmul.f32 %v1119_v45, %v1367_v51  ;;  %v707_v49 = vmax.f32 %v682_v47, 1e-24 }
 0x276   : > { %1128 = vrsqrt.f32 %v706_v46 }
 0x277   : > { %750 = vst [vmem:[%s1435_s11 + $0x8] sm:$0xff] %v734_v48  ;;  %1130 = vrsqrt.f32 %v707_v49  ;;  %v684_v50 = vpop.xlane.xlu1 %683 }
 0x278   : > { %v1121_v52 = vpop.eup %1120  ;;  %v708_v54 = vmax.f32 %v684_v50, 1e-24  ;;  %v686_v55 = vpop.xlane.xlu0 %685 }
 0x279   : > { %v1123_v57 = vpop.eup %1122  ;;  %v736_v59 = vmul.f32 %v1121_v52, %v1373_v56  ;;  %v709_v60 = vmax.f32 %v686_v55, 1e-24 }
 0x27a   : > { %v733_v61 = vmul.f32 %v1123_v57, %v1369_v53  ;;  %1132 = vrsqrt.f32 %v708_v54 }
 0x27b   : > { %752 = vst [vmem:[%s1435_s11 + $0x18] sm:$0xff] %v736_v59  ;;  %1134 = vrsqrt.f32 %v709_v60  ;;  %v688_v51 = vpop.xlane.xlu1 %687 }
 0x27c   : > { %v1125_v62 = vpop.eup %1124  ;;  %749 = vst [vmem:[%s1435_s11] sm:$0xff] %v733_v61  ;;  %v710_v1 = vmax.f32 %v688_v51, 1e-24  ;;  %v690_v2 = vpop.xlane.xlu0 %689 }
 0x27d   : > { %v1127_v3 = vpop.eup %1126  ;;  %v735_v4 = vmul.f32 %v1125_v62, %v1375_v58  ;;  %v711_v7 = vmax.f32 %v690_v2, 1e-24 }
 0x27e   : > { %v737_v56 = vmul.f32 %v1127_v3, %v1381_v63  ;;  %1136 = vrsqrt.f32 %v710_v1 }
 0x27f   : > { %751 = vst [vmem:[%s1435_s11 + $0x10] sm:$0xff] %v735_v4  ;;  %1138 = vrsqrt.f32 %v711_v7  ;;  %v692_v53 = vpop.xlane.xlu1 %691 }
 0x280   : > { %v1129_v8 = vpop.eup %1128  ;;  %753 = vst [vmem:[%s1435_s11 + $0x20] sm:$0xff] %v737_v56  ;;  %v712_v9 = vmax.f32 %v692_v53, 1e-24  ;;  %v694_v10 = vpop.xlane.xlu0 %693 }
 0x281   : > { %v1131_v13 = vpop.eup %1130  ;;  %v738_v14 = vmul.f32 %v1129_v8, %v1383_v0  ;;  %v713_v15 = vmax.f32 %v694_v10, 1e-24 }
 0x282   : > { %v739_v58 = vmul.f32 %v1131_v13, %v1389_v5  ;;  %1140 = vrsqrt.f32 %v712_v9 }
 0x283   : > { %754 = vst [vmem:[%s1435_s11 + $0x28] sm:$0xff] %v738_v14  ;;  %1142 = vrsqrt.f32 %v713_v15  ;;  %v696_v63 = vpop.xlane.xlu1 %695 }
 0x284   : > { %v1133_v16 = vpop.eup %1132  ;;  %755 = vst [vmem:[%s1435_s11 + $0x30] sm:$0xff] %v739_v58  ;;  %v714_v19 = vmax.f32 %v696_v63, 1e-24  ;;  %v698_v20 = vpop.xlane.xlu0 %697 }
 0x285   : > { %v1135_v21 = vpop.eup %1134  ;;  %v740_v22 = vmul.f32 %v1133_v16, %v1391_v6  ;;  %v715_v25 = vmax.f32 %v698_v20, 1e-24 }
 0x286   : > { %v741_v0 = vmul.f32 %v1135_v21, %v1397_v11  ;;  %1144 = vrsqrt.f32 %v714_v19 }
 0x287   : > { %756 = vst [vmem:[%s1435_s11 + $0x38] sm:$0xff] %v740_v22  ;;  %1146 = vrsqrt.f32 %v715_v25  ;;  %v700_v5 = vpop.xlane.xlu1 %699 }
 0x288   : > { %v1137_v26 = vpop.eup %1136  ;;  %757 = vst [vmem:[%s1435_s11 + $0x40] sm:$0xff] %v741_v0  ;;  %v716_v27 = vmax.f32 %v700_v5, 1e-24 }
 0x289   : > { %v1139_v28 = vpop.eup %1138  ;;  %v742_v31 = vmul.f32 %v1137_v26, %v1399_v12 }
 0x28a   : > { %v743_v32 = vmul.f32 %v1139_v28, %v1405_v17  ;;  %1148 = vrsqrt.f32 %v716_v27 }
 0x28b   : > { %758 = vst [vmem:[%s1435_s11 + $0x48] sm:$0xff] %v742_v31 }
 0x28c   : > { %v1141_v6 = vpop.eup %1140  ;;  %759 = vst [vmem:[%s1435_s11 + $0x50] sm:$0xff] %v743_v32 }
 0x28d   : > { %v1143_v11 = vpop.eup %1142  ;;  %v744_v33 = vmul.f32 %v1141_v6, %v1407_v18 }
 0x28e   : > { %v745_v34 = vmul.f32 %v1143_v11, %v1413_v23 }
 0x28f   : > { %760 = vst [vmem:[%s1435_s11 + $0x58] sm:$0xff] %v744_v33 }
 0x290   : > { %v1145_v35 = vpop.eup %1144  ;;  %761 = vst [vmem:[%s1435_s11 + $0x60] sm:$0xff] %v745_v34 }
 0x291   : > { %v1147_v36 = vpop.eup %1146  ;;  %v746_v37 = vmul.f32 %v1145_v35, %v1415_v24 }
 0x292   : > { %v747_v12 = vmul.f32 %v1147_v36, %v1421_v29 }
 0x293   : > { %762 = vst [vmem:[%s1435_s11 + $0x68] sm:$0xff] %v746_v37 }
 0x294   : > { %v1149_v17 = vpop.eup %1148  ;;  %763 = vst [vmem:[%s1435_s11 + $0x70] sm:$0xff] %v747_v12 }
 0x295   : > { %v748_v38 = vmul.f32 %v1149_v17, %v1423_v30 }
 0x297   : > { %764 = vst [vmem:[%s1435_s11 + $0x78] sm:$0xff] %v748_v38 }
 0x298 PF: > { %s17_s21 = sadd.s32 1, %s1156_s21  }
 0x299   : > { %p14_p4 = scmp.ge.s32.totalorder %s17_s21, 4  }
 0x29b   :  { %16 = sbr.rel (!%p14_p4) target bundleno = 1 (0x1), region = 82 }

</bundles_post_ra>
